<compile_context>
chip_gen: v6e
topology: v6e:2x2x1
jax: 0.10.0
libtpu: 0.0.40
codegen_flags: <defaults>
</compile_context>

<pallas_src>
import functools

import jax
import jax.numpy as jnp
from jax import lax
from jax.experimental import pallas as pl
from jax.experimental.pallas import tpu as pltpu

LN_EPS = 1e-5  # PyTorch nn.LayerNorm default


def _round_up(n, m):
    return pl.cdiv(n, m) * m


def _output_mlp_kernel(x_ref, wg_ref, bias_ref, o_ref, *, inv_n, mu_col):
    # x_ref: (TB, T*C) batch tile (last grid block may contain garbage OOB rows;
    # every computation below is per-row, so garbage stays confined and is masked
    # out when the block is written back).
    x = x_ref[...]                                   # native dtype, feeds the MXU
    x32 = x.astype(jnp.float32)

    # E[x^2] per sample (one-pass variance, f32 accumulation).
    ex2 = jnp.sum(x32 * x32, axis=1, keepdims=True) * inv_n          # (TB, 1)

    # Folded LayerNorm-affine + token-mean + Linear (+ rank-1 "- mu * gmw" fold):
    # one lane-dense MXU matmul.
    z = jnp.dot(x, wg_ref[...], preferred_element_type=jnp.float32)  # (TB, Op)

    if mu_col is not None:
        # mean(x) comes back from the MXU via the 1/(T*C) ones column parked in a
        # padded output lane: select that lane and reduce over Op (cheap) instead of
        # a full cross-lane reduction over T*C.
        col = lax.broadcasted_iota(jnp.int32, z.shape, 1)
        mu = jnp.sum(jnp.where(col == mu_col, z, 0.0), axis=1, keepdims=True)
    else:
        mu = jnp.sum(x32, axis=1, keepdims=True) * inv_n             # (TB, 1)

    # Clamp so one-pass-variance rounding can never feed rsqrt a negative number.
    var = jnp.maximum(ex2 - mu * mu, 0.0) + LN_EPS
    r = lax.rsqrt(var)

    o_ref[...] = (r * z + bias_ref[...]).astype(o_ref.dtype)


def output_mlp(x, gamma, beta, weight, bias, *, block_b=512):
    """OutputMLP forward. x: (B, T, C); gamma/beta: (T, C); weight: (O, C); bias: (O,) -> (B, O)."""
    B, T, C = x.shape
    O = weight.shape[0]
    TC = T * C
    f32 = jnp.float32

    # ---- One-time folded parameters (tiny tensors; hoisted out of the kernel). ----
    g32 = gamma.astype(f32)                                            # (T, C)
    w32 = weight.astype(f32)                                           # (O, C)
    wg = (g32[:, :, None] * (w32.T / T)[None, :, :]).reshape(TC, O)    # (T*C, O)
    gmw = jnp.mean(g32, axis=0) @ w32.T                                # (O,) = mean_t(gamma) @ W^T
    wg = wg - gmw[None, :] * (1.0 / TC)                                # rank-1 fold of "- mu * gmw"
    bias_eff = jnp.mean(beta.astype(f32), axis=0) @ w32.T + bias.astype(f32)  # (O,)

    # Lane-dense output: pad only the tiny per-parameter tensors (never x) so stores
    # are unmasked full-lane vst.  A spare padded lane (if any) hosts the mean column.
    Op = _round_up(O, 128)
    mu_col = O if Op > O else None
    wg = jnp.pad(wg, ((0, 0), (0, Op - O)))
    bias_p = jnp.pad(bias_eff, (0, Op - O)).reshape(1, Op)
    if mu_col is not None:
        wg = wg.at[:, mu_col].set(1.0 / TC)                            # mean(x) via the MXU
    wg = wg.astype(x.dtype)        # matmul operand in the activation dtype (bf16 stays bf16)

    x2d = x.reshape(B, TC)         # metadata-only reshape; x is never padded or copied
    out_dtype = x.dtype

    # ---- Generation-aware VMEM budget and batch-tile size. ----
    try:
        vmem_cap = int(pltpu.get_tpu_info().vmem_capacity_bytes)       # 128 MiB v5e/v6e, 64 MiB v7x
    except Exception:
        vmem_cap = 64 * 1024 * 1024                                    # conservative fallback (v7x)
    budget = vmem_cap * 3 // 4                                         # headroom for internal scratch

    itm = x.dtype.itemsize
    fixed = TC * Op * itm + 2 * Op * 4                 # wg (single-buffered) + bias
    per_row = 2 * TC * itm + 2 * Op * itm + 8 * TC     # x/out double-buffers + f32 temporaries
    tb_budget = max(8, (budget - fixed) // per_row // 8 * 8)
    # TODO(synk): if the resident projection (T*C x Op) alone approaches the VMEM budget
    # (very large T*C on v7x), add an "arbitrary" K grid axis over T*C and accumulate
    # z / sum(x) / sum(x^2) in f32 scratch instead of holding wg whole.

    if B <= 8:
        TB = B                                          # single block == full dim (always legal)
    else:
        # >= 2 grid steps so both v7x TensorCores get work; TB stays a multiple of 8.
        TB = max(8, min(block_b, _round_up(pl.cdiv(B, 2), 8), tb_budget))
    grid = (pl.cdiv(B, TB),)                            # ragged last block; OOB rows masked on write

    kernel = functools.partial(_output_mlp_kernel, inv_n=1.0 / TC, mu_col=mu_col)

    out = pl.pallas_call(
        kernel,
        out_shape=jax.ShapeDtypeStruct((B, Op), out_dtype),
        grid=grid,
        in_specs=[
            pl.BlockSpec((TB, TC), lambda i: (i, 0)),                  # batch tile of x (no pads)
            pl.BlockSpec((TC, Op), lambda i: (0, 0),
                         pipeline_mode=pl.Buffered(1)),                # folded projection (grid-invariant)
            pl.BlockSpec((1, Op), lambda i: (0, 0),
                         pipeline_mode=pl.Buffered(1)),                # folded bias (grid-invariant)
        ],
        out_specs=pl.BlockSpec((TB, Op), lambda i: (i, 0)),
        compiler_params=pltpu.CompilerParams(
            dimension_semantics=("parallel",),
            vmem_limit_bytes=int(budget),
        ),
    )(x2d, wg, bias_p)

    return out[:, :O]


def output_mlp_ref(x, gamma, beta, weight, bias):
    x32 = x.astype(jnp.float32)
    mu = jnp.mean(x32, axis=(1, 2), keepdims=True)
    var = jnp.mean((x32 - mu) ** 2, axis=(1, 2), keepdims=True)
    x_hat = (x32 - mu) / jnp.sqrt(var + LN_EPS)
    y = x_hat * gamma.astype(jnp.float32) + beta.astype(jnp.float32)
    pooled = jnp.mean(y, axis=1)                                        # (B, C)
    return (pooled @ weight.astype(jnp.float32).T + bias.astype(jnp.float32)
            ).astype(x.dtype)


if __name__ == "__main__":
    # Shapes consistent with the module's forward: (B, n_tokens, n_channel).
    B, T, C, O = 2, 8, 32, 16

    key = jax.random.PRNGKey(0)
    kx, kg, kb, kw, kbias, kx2 = jax.random.split(key, 6)

    x = jax.random.normal(kx, (B, T, C), dtype=jnp.float32)
    gamma = 1.0 + 0.1 * jax.random.normal(kg, (T, C), dtype=jnp.float32)
    beta = 0.1 * jax.random.normal(kb, (T, C), dtype=jnp.float32)
    weight = 0.1 * jax.random.normal(kw, (O, C), dtype=jnp.float32)     # nn.Linear weight (O, C)
    bias = 0.1 * jax.random.normal(kbias, (O,), dtype=jnp.float32)

    out = jax.block_until_ready(output_mlp(x, gamma, beta, weight, bias))
    ref = output_mlp_ref(x, gamma, beta, weight, bias)
    assert out.shape == (B, O), out.shape
    # Folded algebra / one-pass variance reorder the f32 reductions slightly -> 1e-4.
    err = float(jnp.max(jnp.abs(out - ref)))
    assert jnp.allclose(out, ref, atol=1e-4, rtol=1e-4), ("mismatch", err)

    # Also exercise the multi-step grid with a ragged last batch block (no wrapper pads).
    B2 = 20
    x2 = jax.random.normal(kx2, (B2, T, C), dtype=jnp.float32)
    out2 = jax.block_until_ready(output_mlp(x2, gamma, beta, weight, bias, block_b=8))
    ref2 = output_mlp_ref(x2, gamma, beta, weight, bias)
    assert out2.shape == (B2, O), out2.shape
    err2 = float(jnp.max(jnp.abs(out2 - ref2)))
    assert jnp.allclose(out2, ref2, atol=1e-4, rtol=1e-4), ("mismatch_ragged", err2)

    print("KERNEL_OK")
</pallas_src>

<mosaic_0001>
module attributes {stable_mosaic.version = 11 : i64} {
  func.func @_output_mlp_kernel(%arg0: i32, %arg1: memref<2x256xf32, #tpu.memory_space<vmem>>, %arg2: memref<256x128xf32, #tpu.memory_space<vmem>>, %arg3: memref<1x128xf32, #tpu.memory_space<vmem>>, %arg4: memref<2x128xf32, #tpu.memory_space<vmem>>) attributes {dimension_semantics = [#tpu.dimension_semantics<parallel>], iteration_bounds = array<i64: 1>, scalar_prefetch = 0 : i64, scratch_operands = 0 : i64, tpu.core_type = #tpu.core_type<tc>, window_params = [{transform_indices = @transform_0, window_bounds = array<i64: 2, 256>}, {pipeline_mode = #tpu.pipeline_mode<synchronous>, transform_indices = @transform_1, window_bounds = array<i64: 256, 128>}, {pipeline_mode = #tpu.pipeline_mode<synchronous>, transform_indices = @transform_2, window_bounds = array<i64: 1, 128>}, {transform_indices = @transform_3, window_bounds = array<i64: 2, 128>}]} {
    %c0 = arith.constant 0 : index
    %c0_0 = arith.constant 0 : index
    %0 = vector.load %arg1[%c0, %c0_0] : memref<2x256xf32, #tpu.memory_space<vmem>>, vector<2x256xf32>
    %1 = arith.mulf %0, %0 : vector<2x256xf32>
    %cst = arith.constant dense<0.000000e+00> : vector<2xf32>
    %2 = vector.multi_reduction <add>, %1, %cst [1] : vector<2x256xf32> to vector<2xf32>
    %3 = vector.shape_cast %2 : vector<2xf32> to vector<2x1xf32>
    %cst_1 = arith.constant 3.906250e-03 : f32
    %4 = vector.broadcast %cst_1 : f32 to vector<2x1xf32>
    %5 = arith.mulf %3, %4 : vector<2x1xf32>
    %c0_2 = arith.constant 0 : index
    %c0_3 = arith.constant 0 : index
    %6 = vector.load %arg2[%c0_2, %c0_3] : memref<256x128xf32, #tpu.memory_space<vmem>>, vector<256x128xf32>
    %cst_4 = arith.constant dense<0.000000e+00> : vector<2x128xf32>
    %7 = tpu.matmul %0, %6, %cst_4 {dimension_numbers = #tpu.dot_dimension_numbers<[1], [0], [0], [1], [0, 0, 1, 1], [], []>} : vector<2x256xf32>, vector<256x128xf32>, vector<2x128xf32> -> vector<2x128xf32>
    %8 = tpu.iota {dimensions = array<i32: 1>} : vector<2x128xi32>
    %c16_i32 = arith.constant 16 : i32
    %9 = vector.broadcast %c16_i32 : i32 to vector<2x128xi32>
    %10 = arith.cmpi eq, %8, %9 : vector<2x128xi32>
    %cst_5 = arith.constant 0.000000e+00 : f32
    %11 = vector.broadcast %cst_5 : f32 to vector<2x128xf32>
    %12 = arith.select %10, %7, %11 : vector<2x128xi1>, vector<2x128xf32>
    %cst_6 = arith.constant dense<0.000000e+00> : vector<2xf32>
    %13 = vector.multi_reduction <add>, %12, %cst_6 [1] : vector<2x128xf32> to vector<2xf32>
    %14 = vector.shape_cast %13 : vector<2xf32> to vector<2x1xf32>
    %15 = arith.mulf %14, %14 : vector<2x1xf32>
    %16 = arith.subf %5, %15 : vector<2x1xf32>
    %cst_7 = arith.constant 0.000000e+00 : f32
    %17 = vector.broadcast %cst_7 : f32 to vector<2x1xf32>
    %18 = arith.maximumf %16, %17 : vector<2x1xf32>
    %cst_8 = arith.constant 9.99999974E-6 : f32
    %19 = vector.broadcast %cst_8 : f32 to vector<2x1xf32>
    %20 = arith.addf %18, %19 : vector<2x1xf32>
    %21 = math.rsqrt %20 : vector<2x1xf32>
    %22 = vector.broadcast %21 : vector<2x1xf32> to vector<2x128xf32>
    %23 = arith.mulf %22, %7 : vector<2x128xf32>
    %c0_9 = arith.constant 0 : index
    %c0_10 = arith.constant 0 : index
    %24 = vector.load %arg3[%c0_9, %c0_10] : memref<1x128xf32, #tpu.memory_space<vmem>>, vector<1x128xf32>
    %25 = vector.broadcast %24 : vector<1x128xf32> to vector<2x128xf32>
    %26 = arith.addf %23, %25 : vector<2x128xf32>
    %c0_11 = arith.constant 0 : index
    %c0_12 = arith.constant 0 : index
    %27 = vector.load %arg4[%c0_11, %c0_12] : memref<2x128xf32, #tpu.memory_space<vmem>>, vector<2x128xf32>
    tpu.vector_store %arg4[%c0_11, %c0_12], %26 {strides = array<i32>} : memref<2x128xf32, #tpu.memory_space<vmem>>, vector<2x128xf32>,
    return
  }
  func.func @transform_0(%arg0: i32) -> (i32, i32) {
    %c0_i32 = arith.constant 0 : i32
    %c0_i32_0 = arith.constant 0 : i32
    return %arg0, %c0_i32 : i32, i32
  }
  func.func @transform_1(%arg0: i32) -> (i32, i32) {
    %c0_i32 = arith.constant 0 : i32
    %c0_i32_0 = arith.constant 0 : i32
    %c0_i32_1 = arith.constant 0 : i32
    return %c0_i32, %c0_i32_0 : i32, i32
  }
  func.func @transform_2(%arg0: i32) -> (i32, i32) {
    %c0_i32 = arith.constant 0 : i32
    %c0_i32_0 = arith.constant 0 : i32
    %c0_i32_1 = arith.constant 0 : i32
    return %c0_i32, %c0_i32_0 : i32, i32
  }
  func.func @transform_3(%arg0: i32) -> (i32, i32) {
    %c0_i32 = arith.constant 0 : i32
    %c0_i32_0 = arith.constant 0 : i32
    return %arg0, %c0_i32 : i32, i32
  }
}

</mosaic_0001>

<bundles_post_ra>
// kernel: tpu_custom_call.1
= control target key start
LH: loop header
LB: loop body
LE: loop exit
PB: predicated region body
PF: predicated region fallthrough
CT: control target
= control target key end

     0   :  { %8 = vsyncpa [#allocation3], 0  ;;  %s362_s0 = inlined_call_operand.hbm [shape: f32[2,256], index: 0, kind: input, shape index: {}]   ;;  %s363_s1 = inlined_call_operand.hbm [shape: f32[256,128], index: 1, kind: input, shape index: {}]   ;;  %s364_s2 = inlined_call_operand.vmem [shape: f32[1,128], index: 2, kind: input, shape index: {}]   ;;  %s365_s3 = inlined_call_operand.hbm [shape: f32[2,128], index: 3, kind: output, shape index: {}]  }
   0x1   :  { %9 = vsyncpa [#allocation6], 0 }
   0x2   :  { %10 = vsyncpa [#allocation4], 0  ;;  %s322_s12 = smov [#allocation2]   ;;  %s323_s14 = smov [#allocation5]  }
   0x3   :  { %s17_s13 = sshll.u32 %s322_s12, 4  ;;  %s26_s15 = sshll.u32 %s323_s14, 4  ;;  %s18_s13 = int_to_ptr.vmem [resolvable:$true] %s17_s13  ;;  %s27_s15 = int_to_ptr.vmem [resolvable:$true] %s26_s15 }
   0x4   :  { %s264_s16 = scalar_lea.vmem %s18_s13, 64  ;;  %p269_p1 = scmp.lt.s32.totalorder %s18_s13, %s18_s13 }
   0x5   :  { %p265_p0 = scmp.ne.s32.totalorder %s18_s13, %s264_s16  ;;  %p270_p2 = scmp.lt.s32.totalorder %s264_s16, %s264_s16 }
   0x7   :  { %p271_p3 = por %p270_p2, %p269_p1 }
   0x9   :  { %p272_p4 = pnand %p271_p3, %p265_p0 }
   0xb   :  { %275 = shalt.err (!%p272_p4)
}
   0xc   :  { %20 = dma.hbm_to_vmem [thread:$0]  %s362_s0, 64, %s18_s13, [#allocation3]  }
   0xd   :  { %s284_s19 = scalar_lea.vmem %s27_s15, 4096  ;;  %p289_p6 = scmp.lt.s32.totalorder %s27_s15, %s27_s15 }
   0xe   :  { %p285_p5 = scmp.ne.s32.totalorder %s27_s15, %s284_s19  ;;  %p290_p7 = scmp.lt.s32.totalorder %s284_s19, %s284_s19 }
  0x10   :  { %p291_p8 = por %p290_p7, %p289_p6 }
  0x12   :  { %p292_p9 = pnand %p291_p8, %p285_p5 }
  0x14   :  { %295 = shalt.err (!%p292_p9)
}
  0x15   :  { %s324_s20 = smov 128   ;;  %s325_s21 = smov 8  }
  0x16   :  { %32 = dma.hbm_to_vmem [thread:$0]  %s363_s1, 4096, %s27_s15, [#allocation6], %s324_s20, %s324_s20, %s325_s21  }
  0x17   :  { %316 = dma.done.wait [#allocation3], 64  }
  0x18   :  { %317 = vsyncadd [#allocation3], 4294967232 }
  0x19   :  { %318 = dma.done.wait [#allocation6], 4096  }
  0x1a   :  { %319 = vsyncadd [#allocation6], 4294963200  ;;  %v326_v0 = vmov 1983009808   ;;  %v47_v2 = vlaneseq  ;;  %v92_v3 = vld [vmem:[#allocation5 + $0xf8] sm:$0xff]  ;;  %v91_v5 = vld [vmem:[#allocation5 + $0xf0] sm:$0xff] }
  0x1b   :  { %v45_v1 = vunpack.c.l.s4 %v326_v0  ;;  %v76_v4 = vld [vmem:[#allocation5 + $0x78] sm:$0xff]  ;;  %213 = vmatprep.subr.mxu0 %v92_v3  ;;  %v75_v6 = vld [vmem:[#allocation5 + $0x70] sm:$0xff]  ;;  %v90_v7 = vld [vmem:[#allocation5 + $0xe8] sm:$0xff]  ;;  %vm54_vm0 = vcmask 1041408   ;;  %s327_s24 = smov [#allocation7]  }
  0x1c   :  { %214 = vmatpush3.msra.mxu0 %v76_v4  ;;  %v74_v8 = vld [vmem:[#allocation5 + $0x68] sm:$0xff]  ;;  %v48_v10 = vshrl.u32 %v47_v2, 7  ;;  %v89_v11 = vld [vmem:[#allocation5 + $0xe0] sm:$0xff]  ;;  %v88_v13 = vld [vmem:[#allocation5 + $0xd8] sm:$0xff]  ;;  %v175_v47 = vand.u32 127, %v47_v2  ;;  %s202_s25 = sshll.u32 %s327_s24, 4  ;;  %s203_s25 = int_to_ptr.vmem [resolvable:$true] %s202_s25 }
  0x1d   :  { %215 = vmatprep.subr.mxu0 %v91_v5  ;;  %v46_v9 = vunpack.c.0.s8 %v45_v1  ;;  %v73_v12 = vld [vmem:[#allocation5 + $0x60] sm:$0xff]  ;;  %v72_v14 = vld [vmem:[#allocation5 + $0x58] sm:$0xff]  ;;  %v87_v16 = vld [vmem:[#allocation5 + $0xd0] sm:$0xff]  ;;  %s296_s26 = scalar_lea.vmem %s203_s25, 32  ;;  %p301_p11 = scmp.lt.s32.totalorder %s203_s25, %s203_s25 }
  0x1e   :  { %216 = vmatpush3.msra.mxu0 %v75_v6  ;;  %v71_v17 = vld [vmem:[#allocation5 + $0x50] sm:$0xff]  ;;  %v86_v18 = vld [vmem:[#allocation5 + $0xc8] sm:$0xff]  ;;  %v41_v19 = vld [vmem:[#allocation2] sm:$0xf]  ;;  %vm176_vm1 = vcmp.eq.s32.totalorder %v175_v47, 16  ;;  %p297_p10 = scmp.ne.s32.totalorder %s203_s25, %s296_s26  ;;  %p302_p12 = scmp.lt.s32.totalorder %s296_s26, %s296_s26 }
  0x1f   :  { %217 = vmatprep.subr.mxu0 %v90_v7  ;;  %v49_v15 = vsub.s32 %v46_v9, %v48_v10  ;;  %v70_v20 = vld [vmem:[#allocation5 + $0x48] sm:$0xff]  ;;  %v85_v22 = vld [vmem:[#allocation5 + $0xc0] sm:$0xff]  ;;  %v84_v25 = vld [vmem:[#allocation5 + $0xb8] sm:$0xff]  ;;  %v42_v41 = vmul.f32 %v41_v19, %v41_v19 }
  0x20   :  { %218 = vmatpush3.msra.mxu0 %v74_v8  ;;  %v69_v23 = vld [vmem:[#allocation5 + $0x40] sm:$0xff]  ;;  %v68_v26 = vld [vmem:[#allocation5 + $0x38] sm:$0xff]  ;;  %v83_v27 = vld [vmem:[#allocation5 + $0xb0] sm:$0xff]  ;;  %p303_p13 = por %p302_p12, %p301_p11 }
  0x21   :  { %219 = vmatprep.subr.mxu0 %v89_v11  ;;  %v100_v21 = vrot.slane %v41_v19, %v49_v15  ;;  %v67_v28 = vld [vmem:[#allocation5 + $0x30] sm:$0xff]  ;;  %v82_v29 = vld [vmem:[#allocation5 + $0xa8] sm:$0xff]  ;;  %v81_v31 = vld [vmem:[#allocation5 + $0xa0] sm:$0xff]  ;;  %v50_v42 = vrot.slane %v42_v41, %v49_v15 }
  0x22   :  { %220 = vmatpush3.msra.mxu0 %v73_v12  ;;  %v66_v30 = vld [vmem:[#allocation5 + $0x28] sm:$0xff]  ;;  %v65_v32 = vld [vmem:[#allocation5 + $0x20] sm:$0xff]  ;;  %v80_v33 = vld [vmem:[#allocation5 + $0x98] sm:$0xff]  ;;  %p304_p0 = pnand %p303_p13, %p297_p10 }
  0x23   :  { %221 = vmatprep.subr.mxu0 %v88_v13  ;;  %v101_v24 = vcombine.high %v100_v21, %v100_v21  ;;  %v64_v34 = vld [vmem:[#allocation5 + $0x18] sm:$0xff]  ;;  %v79_v35 = vld [vmem:[#allocation5 + $0x90] sm:$0xff]  ;;  %v78_v37 = vld [vmem:[#allocation5 + $0x88] sm:$0xff]  ;;  %v51_v43 = vcombine.high %v50_v42, %v50_v42  ;;  %v55_v44 = vsel %vm54_vm0, %v50_v42, 0.0 }
  0x24   :  { %222 = vmatpush3.msra.mxu0 %v72_v14  ;;  %v63_v36 = vld [vmem:[#allocation5 + $0x10] sm:$0xff]  ;;  %v62_v38 = vld [vmem:[#allocation5 + $0x8] sm:$0xff]  ;;  %v77_v39 = vld [vmem:[#allocation5 + $0x80] sm:$0xff] }
  0x25   :  { %223 = vmatprep.subr.mxu0 %v87_v16  ;;  %168 = vmatprep.mubr.f32.mxu0 %v101_v24  ;;  %v61_v40 = vld [vmem:[#allocation5] sm:$0xff]  ;;  %v56_v45 = vsel %vm54_vm0, %v51_v43, 0.0  ;;  %v212_v61 = vld [vmem:[%s364_s2] ss:$0 sm:$0xff] }
  0x26   :  { %224 = vmatpush3.msra.mxu0 %v71_v17  ;;  %v57_v46 = vadd.f32 %v56_v45, %v55_v44 }
  0x27   :  { %225 = vmatprep.subr.mxu0 %v86_v18 }
  0x28   :  { %226 = vmatpush3.msra.mxu0 %v70_v20  ;;  %58 = vadd.xlane.f32.xlu0 %v57_v46 }
  0x29   :  { %227 = vmatprep.subr.mxu0 %v85_v22 }
  0x2a   :  { %228 = vmatpush3.msra.mxu0 %v69_v23 }
  0x2b   :  { %229 = vmatprep.subr.mxu0 %v84_v25 }
  0x2c   :  { %230 = vmatpush3.msra.mxu0 %v68_v26 }
  0x2d   :  { %231 = vmatprep.subr.mxu0 %v83_v27 }
  0x2e   :  { %232 = vmatpush3.msra.mxu0 %v67_v28 }
  0x2f   :  { %233 = vmatprep.subr.mxu0 %v82_v29 }
  0x30   :  { %234 = vmatpush3.msra.mxu0 %v66_v30 }
  0x31   :  { %235 = vmatprep.subr.mxu0 %v81_v31 }
  0x32   :  { %236 = vmatpush3.msra.mxu0 %v65_v32 }
  0x33   :  { %237 = vmatprep.subr.mxu0 %v80_v33 }
  0x34   :  { %238 = vmatpush3.msra.mxu0 %v64_v34 }
  0x35   :  { %239 = vmatprep.subr.mxu0 %v79_v35 }
  0x36   :  { %240 = vmatpush3.msra.mxu0 %v63_v36 }
  0x37   :  { %241 = vmatprep.subr.mxu0 %v78_v37 }
  0x38   :  { %242 = vmatpush3.msra.mxu0 %v62_v38 }
  0x39   :  { %243 = vmatprep.subr.mxu0 %v77_v39 }
  0x3a   :  { %244 = vmatpush3.msra.mxu0 %v61_v40 }
  0x3b   :  { %169 = vmatmul.mubr.f32.vlgmr.msra.gmra.mxu0 %v100_v21 }
  0xb1   :  { %v59_v53 = vpop.xlane.xlu0 %58 }
  0xb2   :  { %v60_v55 = vmul.f32 0.00390625, %v59_v53 }
  0xfb   :  { %v245_v48 = vpop.f32.mrf.mxu0 }
  0xfd   :  { %v246_v49 = vpop.f32.mrf.mxu0 }
  0xfe   :  { %v247_v50 = vadd.f32 %v246_v49, %v245_v48 }
 0x100   :  { %v177_v51 = vsel %vm176_vm1, %v247_v50, 0.0 }
 0x101   :  { %v178_v52 = vsel %vm54_vm0, %v177_v51, 0.0 }
 0x102   :  { %179 = vadd.xlane.f32.xlu0 %v178_v52 }
 0x18b   :  { %v180_v54 = vpop.xlane.xlu0 %179 }
 0x18c   :  { %v181_v56 = vmul.f32 %v180_v54, %v180_v54 }
 0x18e   :  { %v182_v57 = vsub.f32 %v60_v55, %v181_v56 }
 0x190   :  { %v183_v58 = vmax.f32 %v182_v57, 0.0 }
 0x192   :  { %v184_v59 = vadd.f32 1e-05, %v183_v58 }
 0x194   :  { %254 = vrsqrt.f32 %v184_v59 }
 0x1a1   :  { %v255_v60 = vpop.eup %254 }
 0x1a2   :  { %v186_v62 = vmul.f32 %v255_v60, %v247_v50 }
 0x1a4   :  { %v194_v63 = vadd.f32 %v212_v61, %v186_v62 }
 0x1a6   :  { %195 = vst [vmem:[#allocation7] sm:$0x3] %v194_v63 }
 0x1a7   :  { %307 = shalt.err (!%p304_p0)
}
 0x1a8   :  { %205 = dma.vmem_to_hbm [thread:$0]  %s203_s25, 32, %s365_s3, [#allocation4]  }
 0x1a9   :  { %320 = dma.done.wait [#allocation4], 32  }
 0x1aa   :  { %321 = vsyncadd [#allocation4], 4294967264 }
 0x1ab   :  { %209 = vsyncpa [#allocation3], 1 }
 0x1ac   :  { %210 = vsyncpa [#allocation6], 1 }
 0x1ad   :  { %211 = vsyncpa [#allocation4], 1 }

</bundles_post_ra>
